<compile_context>
chip_gen: v6e
topology: v6e:2x2x1
jax: 0.10.0
libtpu: 0.0.40
codegen_flags: <defaults>
</compile_context>

<pallas_src>
import jax
import jax.numpy as jnp
from jax.experimental import pallas as pl
from jax.experimental.pallas import tpu as pltpu  # noqa: F401  (TPU backend registration / future tiling)

BN_EPS = 1e-5


# ---------------------------------------------------------------------------
# Fused kernel factory
# ---------------------------------------------------------------------------
def make_fused_mlp_kernel(num_layers):
    """Build a kernel:  relu(bn(x@W0+b0)) -> ... -> x@W_last+b_last.

    Ref order: x, [w_t, b, gamma, beta] * (num_layers-1), w_t_last, b_last, out
    All weights are pre-transposed to (in, out); b/gamma/beta are (1, out).
    """

    def kernel(*refs):
        x_ref = refs[0]
        o_ref = refs[-1]
        p = refs[1:-1]

        h = x_ref[...].astype(jnp.float32)
        idx = 0
        for _ in range(num_layers - 1):
            w_ref, b_ref, g_ref, be_ref = p[idx:idx + 4]
            idx += 4
            # Linear: y = x @ W^T + b   (w_ref already holds W^T, (in, out))
            y = jnp.dot(h, w_ref[...], preferred_element_type=jnp.float32)
            y = y + b_ref[...]
            # BatchNorm1d (training mode): per-feature batch mean / biased var
            mean = jnp.mean(y, axis=0, keepdims=True)
            d = y - mean
            var = jnp.mean(d * d, axis=0, keepdims=True)
            y_bn = d * jax.lax.rsqrt(var + BN_EPS) * g_ref[...] + be_ref[...]
            # ReLU
            h = jnp.maximum(y_bn, 0.0)

        # Final linear (no BN / ReLU)
        w_ref, b_ref = p[idx:idx + 2]
        y = jnp.dot(h, w_ref[...], preferred_element_type=jnp.float32)
        o_ref[...] = (y + b_ref[...]).astype(o_ref.dtype)

    return kernel


def _full_spec(shape):
    # Single grid step: whole operand resident in VMEM.
    return pl.BlockSpec(shape, lambda: tuple(0 for _ in shape))


# ---------------------------------------------------------------------------
# Wrapper: one pallas_call for the whole MLP
# ---------------------------------------------------------------------------
def mlp_forward(x, params, num_layers):
    n = x.shape[0]
    out_dim = params["linears"][-1][0].shape[1]  # w_t is (in, out)

    flat = [x]
    flops = 0
    transc = 0
    for i in range(num_layers - 1):
        w_t, b = params["linears"][i]
        g, be = params["bns"][i]
        flat += [w_t, b, g, be]
        d_in, d_out = w_t.shape
        flops += 2 * n * d_in * d_out + 10 * n * d_out  # matmul + BN/ReLU epilogue
        transc += d_out                                  # rsqrt per feature
    w_t, b = params["linears"][-1]
    flat += [w_t, b]
    d_in, d_out = w_t.shape
    flops += 2 * n * d_in * d_out + n * d_out

    bytes_accessed = sum(int(a.size) * a.dtype.itemsize for a in flat)
    bytes_accessed += n * out_dim * 4

    return pl.pallas_call(
        make_fused_mlp_kernel(num_layers),
        out_shape=jax.ShapeDtypeStruct((n, out_dim), jnp.float32),
        in_specs=[_full_spec(a.shape) for a in flat],
        out_specs=_full_spec((n, out_dim)),
        cost_estimate=pl.CostEstimate(
            flops=flops, transcendentals=transc, bytes_accessed=bytes_accessed
        ),
    )(*flat)


# ---------------------------------------------------------------------------
# Parameter init (weights pre-transposed, vectors pre-reshaped — done ONCE)
# ---------------------------------------------------------------------------
def init_mlp_params(key, num_layers, input_dim, hidden_dim, output_dim):
    """Deterministic synthetic init matching nn.Linear / nn.BatchNorm1d.

    Stored layout is kernel-friendly:
      linears[i] = (W^T of shape (in, out), bias of shape (1, out))
      bns[i]     = (gamma (1, hidden), beta (1, hidden))
    """
    if num_layers < 1:
        raise ValueError("number of layers should be positive!")
    params = {"linears": [], "bns": []}
    dims = (
        [(input_dim, output_dim)]
        if num_layers == 1
        else [(input_dim, hidden_dim)]
        + [(hidden_dim, hidden_dim)] * (num_layers - 2)
        + [(hidden_dim, output_dim)]
    )
    for (d_in, d_out) in dims:
        key, kw, kb = jax.random.split(key, 3)
        bound = 1.0 / jnp.sqrt(jnp.float32(d_in))
        # PyTorch stores (out, in); we keep the pre-transposed (in, out) form.
        w = jax.random.uniform(kw, (d_out, d_in), jnp.float32, -bound, bound)
        b = jax.random.uniform(kb, (d_out,), jnp.float32, -bound, bound)
        params["linears"].append((jnp.transpose(w), b.reshape(1, d_out)))
    for _ in range(num_layers - 1):
        params["bns"].append(
            (
                jnp.ones((1, hidden_dim), jnp.float32),
                jnp.zeros((1, hidden_dim), jnp.float32),
            )
        )
    return params


# ---------------------------------------------------------------------------
# Pure-JAX reference (same training-mode BN semantics) for a sanity check
# ---------------------------------------------------------------------------
def mlp_reference(x, params, num_layers):
    if num_layers == 1:
        w_t, b = params["linears"][0]
        return x @ w_t + b
    h = x
    for i in range(num_layers - 1):
        w_t, b = params["linears"][i]
        gamma, beta = params["bns"][i]
        y = h @ w_t + b
        mean = jnp.mean(y, axis=0, keepdims=True)
        var = jnp.mean((y - mean) ** 2, axis=0, keepdims=True)
        h = jnp.maximum((y - mean) / jnp.sqrt(var + BN_EPS) * gamma + beta, 0.0)
    w_t, b = params["linears"][-1]
    return h @ w_t + b


if __name__ == "__main__":
    key = jax.random.PRNGKey(0)
    num_layers, input_dim, hidden_dim, output_dim = 3, 16, 32, 8
    batch = 8  # multiple of 8 (fp32 sublane); use multiples of 16 if bf16 activations are adopted

    k_x, k_p = jax.random.split(key)
    x = jax.random.normal(k_x, (batch, input_dim), jnp.float32)
    params = init_mlp_params(k_p, num_layers, input_dim, hidden_dim, output_dim)

    out = mlp_forward(x, params, num_layers)
    out = jax.block_until_ready(out)

    ref = mlp_reference(x, params, num_layers)
    assert out.shape == (batch, output_dim)
    assert jnp.allclose(out, ref, atol=1e-4, rtol=1e-4), "mismatch vs reference"

    # Also exercise the num_layers == 1 (pure linear) path.
    params1 = init_mlp_params(k_p, 1, input_dim, hidden_dim, output_dim)
    out1 = jax.block_until_ready(mlp_forward(x, params1, 1))
    ref1 = mlp_reference(x, params1, 1)
    assert out1.shape == (batch, output_dim)
    assert jnp.allclose(out1, ref1, atol=1e-4, rtol=1e-4), "mismatch vs reference (1-layer)"

    print("KERNEL_OK")
</pallas_src>

<mosaic_0001>
module attributes {stable_mosaic.version = 11 : i64} {
  func.func @kernel(%arg0: memref<8x16xf32, #tpu.memory_space<vmem>>, %arg1: memref<16x32xf32, #tpu.memory_space<vmem>>, %arg2: memref<1x32xf32, #tpu.memory_space<vmem>>, %arg3: memref<1x32xf32, #tpu.memory_space<vmem>>, %arg4: memref<1x32xf32, #tpu.memory_space<vmem>>, %arg5: memref<32x32xf32, #tpu.memory_space<vmem>>, %arg6: memref<1x32xf32, #tpu.memory_space<vmem>>, %arg7: memref<1x32xf32, #tpu.memory_space<vmem>>, %arg8: memref<1x32xf32, #tpu.memory_space<vmem>>, %arg9: memref<32x8xf32, #tpu.memory_space<vmem>>, %arg10: memref<1x8xf32, #tpu.memory_space<vmem>>, %arg11: memref<8x8xf32, #tpu.memory_space<vmem>>) attributes {dimension_semantics = [], scalar_prefetch = 0 : i64, scratch_operands = 0 : i64, tpu.core_type = #tpu.core_type<tc>} {
    %c0 = arith.constant 0 : index
    %c0_0 = arith.constant 0 : index
    %0 = vector.load %arg0[%c0, %c0_0] : memref<8x16xf32, #tpu.memory_space<vmem>>, vector<8x16xf32>
    %c0_1 = arith.constant 0 : index
    %c0_2 = arith.constant 0 : index
    %1 = vector.load %arg1[%c0_1, %c0_2] : memref<16x32xf32, #tpu.memory_space<vmem>>, vector<16x32xf32>
    %cst = arith.constant dense<0.000000e+00> : vector<8x32xf32>
    %2 = tpu.matmul %0, %1, %cst {dimension_numbers = #tpu.dot_dimension_numbers<[1], [0], [0], [1], [0, 0, 1, 1], [], []>} : vector<8x16xf32>, vector<16x32xf32>, vector<8x32xf32> -> vector<8x32xf32>
    %c0_3 = arith.constant 0 : index
    %c0_4 = arith.constant 0 : index
    %3 = vector.load %arg2[%c0_3, %c0_4] : memref<1x32xf32, #tpu.memory_space<vmem>>, vector<1x32xf32>
    %4 = vector.broadcast %3 : vector<1x32xf32> to vector<8x32xf32>
    %5 = arith.addf %2, %4 : vector<8x32xf32>
    %cst_5 = arith.constant dense<0.000000e+00> : vector<32xf32>
    %6 = vector.multi_reduction <add>, %5, %cst_5 [0] : vector<8x32xf32> to vector<32xf32>
    %7 = vector.shape_cast %6 : vector<32xf32> to vector<1x32xf32>
    %cst_6 = arith.constant 8.000000e+00 : f32
    %8 = vector.broadcast %cst_6 : f32 to vector<1x32xf32>
    %9 = arith.divf %7, %8 : vector<1x32xf32>
    %10 = vector.broadcast %9 : vector<1x32xf32> to vector<8x32xf32>
    %11 = arith.subf %5, %10 : vector<8x32xf32>
    %12 = arith.mulf %11, %11 : vector<8x32xf32>
    %cst_7 = arith.constant dense<0.000000e+00> : vector<32xf32>
    %13 = vector.multi_reduction <add>, %12, %cst_7 [0] : vector<8x32xf32> to vector<32xf32>
    %14 = vector.shape_cast %13 : vector<32xf32> to vector<1x32xf32>
    %cst_8 = arith.constant 8.000000e+00 : f32
    %15 = vector.broadcast %cst_8 : f32 to vector<1x32xf32>
    %16 = arith.divf %14, %15 : vector<1x32xf32>
    %cst_9 = arith.constant 9.99999974E-6 : f32
    %17 = vector.broadcast %cst_9 : f32 to vector<1x32xf32>
    %18 = arith.addf %16, %17 : vector<1x32xf32>
    %19 = math.rsqrt %18 : vector<1x32xf32>
    %20 = vector.broadcast %19 : vector<1x32xf32> to vector<8x32xf32>
    %21 = arith.mulf %11, %20 : vector<8x32xf32>
    %c0_10 = arith.constant 0 : index
    %c0_11 = arith.constant 0 : index
    %22 = vector.load %arg3[%c0_10, %c0_11] : memref<1x32xf32, #tpu.memory_space<vmem>>, vector<1x32xf32>
    %23 = vector.broadcast %22 : vector<1x32xf32> to vector<8x32xf32>
    %24 = arith.mulf %21, %23 : vector<8x32xf32>
    %c0_12 = arith.constant 0 : index
    %c0_13 = arith.constant 0 : index
    %25 = vector.load %arg4[%c0_12, %c0_13] : memref<1x32xf32, #tpu.memory_space<vmem>>, vector<1x32xf32>
    %26 = vector.broadcast %25 : vector<1x32xf32> to vector<8x32xf32>
    %27 = arith.addf %24, %26 : vector<8x32xf32>
    %cst_14 = arith.constant 0.000000e+00 : f32
    %28 = vector.broadcast %cst_14 : f32 to vector<8x32xf32>
    %29 = arith.maximumf %27, %28 : vector<8x32xf32>
    %c0_15 = arith.constant 0 : index
    %c0_16 = arith.constant 0 : index
    %30 = vector.load %arg5[%c0_15, %c0_16] : memref<32x32xf32, #tpu.memory_space<vmem>>, vector<32x32xf32>
    %cst_17 = arith.constant dense<0.000000e+00> : vector<8x32xf32>
    %31 = tpu.matmul %29, %30, %cst_17 {dimension_numbers = #tpu.dot_dimension_numbers<[1], [0], [0], [1], [0, 0, 1, 1], [], []>} : vector<8x32xf32>, vector<32x32xf32>, vector<8x32xf32> -> vector<8x32xf32>
    %c0_18 = arith.constant 0 : index
    %c0_19 = arith.constant 0 : index
    %32 = vector.load %arg6[%c0_18, %c0_19] : memref<1x32xf32, #tpu.memory_space<vmem>>, vector<1x32xf32>
    %33 = vector.broadcast %32 : vector<1x32xf32> to vector<8x32xf32>
    %34 = arith.addf %31, %33 : vector<8x32xf32>
    %cst_20 = arith.constant dense<0.000000e+00> : vector<32xf32>
    %35 = vector.multi_reduction <add>, %34, %cst_20 [0] : vector<8x32xf32> to vector<32xf32>
    %36 = vector.shape_cast %35 : vector<32xf32> to vector<1x32xf32>
    %cst_21 = arith.constant 8.000000e+00 : f32
    %37 = vector.broadcast %cst_21 : f32 to vector<1x32xf32>
    %38 = arith.divf %36, %37 : vector<1x32xf32>
    %39 = vector.broadcast %38 : vector<1x32xf32> to vector<8x32xf32>
    %40 = arith.subf %34, %39 : vector<8x32xf32>
    %41 = arith.mulf %40, %40 : vector<8x32xf32>
    %cst_22 = arith.constant dense<0.000000e+00> : vector<32xf32>
    %42 = vector.multi_reduction <add>, %41, %cst_22 [0] : vector<8x32xf32> to vector<32xf32>
    %43 = vector.shape_cast %42 : vector<32xf32> to vector<1x32xf32>
    %cst_23 = arith.constant 8.000000e+00 : f32
    %44 = vector.broadcast %cst_23 : f32 to vector<1x32xf32>
    %45 = arith.divf %43, %44 : vector<1x32xf32>
    %cst_24 = arith.constant 9.99999974E-6 : f32
    %46 = vector.broadcast %cst_24 : f32 to vector<1x32xf32>
    %47 = arith.addf %45, %46 : vector<1x32xf32>
    %48 = math.rsqrt %47 : vector<1x32xf32>
    %49 = vector.broadcast %48 : vector<1x32xf32> to vector<8x32xf32>
    %50 = arith.mulf %40, %49 : vector<8x32xf32>
    %c0_25 = arith.constant 0 : index
    %c0_26 = arith.constant 0 : index
    %51 = vector.load %arg7[%c0_25, %c0_26] : memref<1x32xf32, #tpu.memory_space<vmem>>, vector<1x32xf32>
    %52 = vector.broadcast %51 : vector<1x32xf32> to vector<8x32xf32>
    %53 = arith.mulf %50, %52 : vector<8x32xf32>
    %c0_27 = arith.constant 0 : index
    %c0_28 = arith.constant 0 : index
    %54 = vector.load %arg8[%c0_27, %c0_28] : memref<1x32xf32, #tpu.memory_space<vmem>>, vector<1x32xf32>
    %55 = vector.broadcast %54 : vector<1x32xf32> to vector<8x32xf32>
    %56 = arith.addf %53, %55 : vector<8x32xf32>
    %cst_29 = arith.constant 0.000000e+00 : f32
    %57 = vector.broadcast %cst_29 : f32 to vector<8x32xf32>
    %58 = arith.maximumf %56, %57 : vector<8x32xf32>
    %c0_30 = arith.constant 0 : index
    %c0_31 = arith.constant 0 : index
    %59 = vector.load %arg9[%c0_30, %c0_31] : memref<32x8xf32, #tpu.memory_space<vmem>>, vector<32x8xf32>
    %cst_32 = arith.constant dense<0.000000e+00> : vector<8x8xf32>
    %60 = tpu.matmul %58, %59, %cst_32 {dimension_numbers = #tpu.dot_dimension_numbers<[1], [0], [0], [1], [0, 0, 1, 1], [], []>} : vector<8x32xf32>, vector<32x8xf32>, vector<8x8xf32> -> vector<8x8xf32>
    %c0_33 = arith.constant 0 : index
    %c0_34 = arith.constant 0 : index
    %61 = vector.load %arg10[%c0_33, %c0_34] : memref<1x8xf32, #tpu.memory_space<vmem>>, vector<1x8xf32>
    %62 = vector.broadcast %61 : vector<1x8xf32> to vector<8x8xf32>
    %63 = arith.addf %60, %62 : vector<8x8xf32>
    %c0_35 = arith.constant 0 : index
    %c0_36 = arith.constant 0 : index
    %64 = vector.load %arg11[%c0_35, %c0_36] : memref<8x8xf32, #tpu.memory_space<vmem>>, vector<8x8xf32>
    tpu.vector_store %arg11[%c0_35, %c0_36], %63 {strides = array<i32>} : memref<8x8xf32, #tpu.memory_space<vmem>>, vector<8x8xf32>,
    return
  }
}

</mosaic_0001>

<bundles_post_ra>
// kernel: tpu_custom_call.1
= control target key start
LH: loop header
LB: loop body
LE: loop exit
PB: predicated region body
PF: predicated region fallthrough
CT: control target
= control target key end

     0   :  { %16 = vsyncpa [#allocation3], 0  ;;  %s852_s0 = inlined_call_operand.hbm [shape: f32[8,16], index: 0, kind: input, shape index: {}]   ;;  %s853_s1 = inlined_call_operand.vmem [shape: f32[16,32], index: 1, kind: input, shape index: {}]   ;;  %s854_s2 = inlined_call_operand.hbm [shape: f32[1,32], index: 2, kind: input, shape index: {}]   ;;  %s855_s3 = inlined_call_operand.hbm [shape: f32[1,32], index: 3, kind: input, shape index: {}]   ;;  %s856_s4 = inlined_call_operand.hbm [shape: f32[1,32], index: 4, kind: input, shape index: {}]   ;;  %s857_s5 = inlined_call_operand.vmem [shape: f32[32,32], index: 5, kind: input, shape index: {}]   ;;  %s858_s6 = inlined_call_operand.hbm [shape: f32[1,32], index: 6, kind: input, shape index: {}]   ;;  %s859_s7 = inlined_call_operand.hbm [shape: f32[1,32], index: 7, kind: input, shape index: {}]   ;;  %s860_s8 = inlined_call_operand.hbm [shape: f32[1,32], index: 8, kind: input, shape index: {}]   ;;  %s861_s9 = inlined_call_operand.vmem [shape: f32[32,8], index: 9, kind: input, shape index: {}]   ;;  %s862_s10 = inlined_call_operand.vmem [shape: f32[1,8], index: 10, kind: input, shape index: {}]   ;;  %s863_s11 = inlined_call_operand.hbm [shape: f32[8,8], index: 11, kind: output, shape index: {}]  }
   0x1   :  { %17 = vsyncpa [#allocation6], 0 }
   0x2   :  { %18 = vsyncpa [#allocation9], 0 }
   0x3   :  { %19 = vsyncpa [#allocation12], 0 }
   0x4   :  { %20 = vsyncpa [#allocation4], 0  ;;  %s706_s17 = smov [#allocation5]   ;;  %s707_s19 = smov [#allocation8]  }
   0x5   :  { %s39_s18 = sshll.u32 %s706_s17, 4  ;;  %s59_s20 = sshll.u32 %s707_s19, 4  ;;  %s40_s18 = int_to_ptr.vmem [resolvable:$true] %s39_s18  ;;  %s60_s20 = int_to_ptr.vmem [resolvable:$true] %s59_s20 }
   0x6   :  { %s544_s21 = scalar_lea.vmem %s40_s18, 16  ;;  %s548_s22 = scalar_lea.vmem %s40_s18, 32 }
   0x7   :  { %p545_p0 = scmp.ne.s32.totalorder %s40_s18, %s544_s21  ;;  %p549_p1 = scmp.lt.s32.totalorder %s40_s18, %s40_s18 }
   0x8   :  { %p550_p2 = scmp.lt.s32.totalorder %s548_s22, %s544_s21 }
   0xa   :  { %p551_p3 = por %p550_p2, %p549_p1 }
   0xc   :  { %p552_p4 = pnand %p551_p3, %p545_p0 }
   0xe   :  { %555 = shalt.err (!%p552_p4)
}
   0xf   :  { %42 = dma.hbm_to_vmem [thread:$0]  %s854_s2, 16, %s40_s18, [#allocation6]  }
  0x10   :  { %s564_s25 = scalar_lea.vmem %s60_s20, 16  ;;  %s568_s26 = scalar_lea.vmem %s60_s20, 32 }
  0x11   :  { %p565_p5 = scmp.ne.s32.totalorder %s60_s20, %s564_s25  ;;  %p569_p6 = scmp.lt.s32.totalorder %s60_s20, %s60_s20 }
  0x12   :  { %p570_p7 = scmp.lt.s32.totalorder %s568_s26, %s564_s25 }
  0x14   :  { %p571_p8 = por %p570_p7, %p569_p6 }
  0x16   :  { %p572_p9 = pnand %p571_p8, %p565_p5 }
  0x18   :  { %575 = shalt.err (!%p572_p9)
}
  0x19   :  { %62 = dma.hbm_to_vmem [thread:$0]  %s856_s4, 16, %s60_s20, [#allocation9]  }
  0x1a   :  { %s708_s29 = smov [#allocation11]   ;;  %s709_s12 = smov [#allocation2]  }
  0x1b   :  { %s81_s30 = sshll.u32 %s708_s29, 4  ;;  %s27_s13 = sshll.u32 %s709_s12, 4  ;;  %s82_s30 = int_to_ptr.vmem [resolvable:$true] %s81_s30  ;;  %s28_s13 = int_to_ptr.vmem [resolvable:$true] %s27_s13 }
  0x1c   :  { %s584_s14 = scalar_lea.vmem %s82_s30, 16  ;;  %s588_s2 = scalar_lea.vmem %s82_s30, 32 }
  0x1d   :  { %p585_p10 = scmp.ne.s32.totalorder %s82_s30, %s584_s14  ;;  %p589_p11 = scmp.lt.s32.totalorder %s82_s30, %s82_s30 }
  0x1e   :  { %p590_p12 = scmp.lt.s32.totalorder %s588_s2, %s584_s14 }
  0x20   :  { %p591_p13 = por %p590_p12, %p589_p11 }
  0x22   :  { %p592_p0 = pnand %p591_p13, %p585_p10 }
  0x24   :  { %595 = shalt.err (!%p592_p0)
}
  0x25   :  { %84 = dma.hbm_to_vmem [thread:$0]  %s859_s7, 16, %s82_s30, [#allocation12]  }
  0x26   :  { %s604_s17 = scalar_lea.vmem %s28_s13, 128  ;;  %p609_p2 = scmp.lt.s32.totalorder %s28_s13, %s28_s13 }
  0x27   :  { %p605_p1 = scmp.ne.s32.totalorder %s28_s13, %s604_s17  ;;  %p610_p3 = scmp.lt.s32.totalorder %s604_s17, %s604_s17 }
  0x29   :  { %p611_p4 = por %p610_p3, %p609_p2 }
  0x2b   :  { %p612_p5 = pnand %p611_p4, %p605_p1 }
  0x2d   :  { %615 = shalt.err (!%p612_p5)
}
  0x2e   :  { %30 = dma.hbm_to_vmem [thread:$0]  %s852_s0, 128, %s28_s13, [#allocation3]  }
  0x2f   :  { %s710_s19 = smov [#allocation7]   ;;  %s711_s21 = smov [#allocation10]  }
  0x30   :  { %s49_s20 = sshll.u32 %s710_s19, 4  ;;  %s71_s22 = sshll.u32 %s711_s21, 4  ;;  %s50_s20 = int_to_ptr.vmem [resolvable:$true] %s49_s20  ;;  %s72_s22 = int_to_ptr.vmem [resolvable:$true] %s71_s22 }
  0x31   :  { %s624_s23 = scalar_lea.vmem %s50_s20, 16  ;;  %s628_s7 = scalar_lea.vmem %s50_s20, 32 }
  0x32   :  { %p625_p6 = scmp.ne.s32.totalorder %s50_s20, %s624_s23  ;;  %p629_p7 = scmp.lt.s32.totalorder %s50_s20, %s50_s20 }
  0x33   :  { %p630_p8 = scmp.lt.s32.totalorder %s628_s7, %s624_s23 }
  0x35   :  { %p631_p9 = por %p630_p8, %p629_p7 }
  0x37   :  { %p632_p10 = pnand %p631_p9, %p625_p6 }
  0x39   :  { %635 = shalt.err (!%p632_p10)
}
  0x3a   :  { %52 = dma.hbm_to_vmem [thread:$0]  %s855_s3, 16, %s50_s20, [#allocation6]  }
  0x3b   :  { %s644_s26 = scalar_lea.vmem %s72_s22, 16  ;;  %s648_s0 = scalar_lea.vmem %s72_s22, 32 }
  0x3c   :  { %p645_p11 = scmp.ne.s32.totalorder %s72_s22, %s644_s26  ;;  %p649_p12 = scmp.lt.s32.totalorder %s72_s22, %s72_s22 }
  0x3d   :  { %p650_p13 = scmp.lt.s32.totalorder %s648_s0, %s644_s26 }
  0x3f   :  { %p651_p0 = por %p650_p13, %p649_p12 }
  0x41   :  { %p652_p1 = pnand %p651_p0, %p645_p11 }
  0x43   :  { %655 = shalt.err (!%p652_p1)
}
  0x44   :  { %74 = dma.hbm_to_vmem [thread:$0]  %s858_s6, 16, %s72_s22, [#allocation9]  }
  0x45   :  { %s712_s29 = smov [#allocation13]  }
  0x46   :  { %s91_s30 = sshll.u32 %s712_s29, 4  ;;  %s92_s30 = int_to_ptr.vmem [resolvable:$true] %s91_s30 }
  0x47   :  { %s664_s12 = scalar_lea.vmem %s92_s30, 16  ;;  %s668_s13 = scalar_lea.vmem %s92_s30, 32 }
  0x48   :  { %p665_p2 = scmp.ne.s32.totalorder %s92_s30, %s664_s12  ;;  %p669_p3 = scmp.lt.s32.totalorder %s92_s30, %s92_s30 }
  0x49   :  { %p670_p4 = scmp.lt.s32.totalorder %s668_s13, %s664_s12 }
  0x4b   :  { %p671_p5 = por %p670_p4, %p669_p3 }
  0x4d   :  { %p672_p6 = pnand %p671_p5, %p665_p2 }
  0x4f   :  { %675 = shalt.err (!%p672_p6)
}
  0x50   :  { %94 = dma.hbm_to_vmem [thread:$0]  %s860_s8, 16, %s92_s30, [#allocation12]  }
  0x51   :  { %696 = dma.done.wait [#allocation3], 128  }
  0x52   :  { %697 = vsyncadd [#allocation3], 4294967168 }
  0x53   :  { %698 = dma.done.wait [#allocation6], 32  }
  0x54   :  { %699 = vsyncadd [#allocation6], 4294967264 }
  0x55   :  { %700 = dma.done.wait [#allocation9], 32  }
  0x56   :  { %701 = vsyncadd [#allocation9], 4294967264 }
  0x57   :  { %702 = dma.done.wait [#allocation12], 32  }
  0x58   :  { %703 = vsyncadd [#allocation12], 4294967264  ;;  %v713_v0 = vmov 0.0   ;;  %vm714_vm0 = vmmov 0   ;;  %v122_v1 = vld [vmem:[%s853_s1 + $0x8] sm:$0xff]  ;;  %v121_v2 = vld [vmem:[%s853_s1] sm:$0xff] }
  0x59   :  { %493 = vmatprep.subr.mxu0 %v713_v0  ;;  %497 = vmatprep.mubr.msk.f32.mxu0 %vm714_vm0, %v713_v0  ;;  %v120_v3 = vld [vmem:[#allocation2] sm:$0xff]  ;;  %vm130_vm1 = vcmask 130048   ;;  %v247_v4 = vld [vmem:[%s857_s5 + $0x18] sm:$0xff]  ;;  %v246_v5 = vld [vmem:[%s857_s5 + $0x10] sm:$0xff]  ;;  %vm204_vm2 = vcmask 261120   ;;  %s715_s28 = smov [#allocation14]  }
  0x5a   :  { %500 = vmatprep.subr.mxu1 %v713_v0  ;;  %508 = vmatprep.mubr.msk.f32.mxu1 %vm714_vm0, %v713_v0  ;;  %v245_v6 = vld [vmem:[%s857_s5 + $0x8] sm:$0xff]  ;;  %v244_v7 = vld [vmem:[%s857_s5] sm:$0xff]  ;;  %v369_v38 = vld [vmem:[%s861_s9 + $0x18] sm:$0xff]  ;;  %s458_s29 = sshll.u32 %s715_s28, 4  ;;  %vm450_vm3 = vcmask 64512   ;;  %s459_s29 = int_to_ptr.vmem [resolvable:$true] %s458_s29 }
  0x5b   :  { %494 = vmatpush3.msra.mxu0 %v122_v1  ;;  %501 = vmatpush3.msra.mxu1 %v247_v4  ;;  %v470_v8 = vld [vmem:[#allocation5] ss:$0 sm:$0xff]  ;;  %v472_v32 = vld [vmem:[#allocation7] ss:$0 sm:$0xff]  ;;  %v473_v34 = vld [vmem:[#allocation8] ss:$0 sm:$0xff]  ;;  %p681_p8 = scmp.lt.s32.totalorder %s459_s29, %s459_s29 }
  0x5c   :  { %495 = vmatprep.subr.mxu0 %v713_v0  ;;  %502 = vmatprep.subr.mxu1 %v713_v0  ;;  %v368_v39 = vld [vmem:[%s861_s9 + $0x10] sm:$0xff]  ;;  %v367_v40 = vld [vmem:[%s861_s9 + $0x8] sm:$0xff]  ;;  %v366_v41 = vld [vmem:[%s861_s9] sm:$0xff]  ;;  %s676_s30 = scalar_lea.vmem %s459_s29, 128 }
  0x5d   :  { %496 = vmatpush3.msra.mxu0 %v121_v2  ;;  %503 = vmatpush3.msra.mxu1 %v246_v5  ;;  %v474_v42 = vld [vmem:[#allocation10] ss:$0 sm:$0xff]  ;;  %v476_v2 = vld [vmem:[#allocation11] ss:$0 sm:$0xff]  ;;  %v477_v4 = vld [vmem:[#allocation13] ss:$0 sm:$0xff]  ;;  %p677_p7 = scmp.ne.s32.totalorder %s459_s29, %s676_s30  ;;  %p682_p9 = scmp.lt.s32.totalorder %s676_s30, %s676_s30 }
  0x5e   :  { %498 = vmatmul.mubr.msk.f32.vlgmr.msra.gmra.mxu0 %vm130_vm1, %v120_v3  ;;  %511 = vmatprep.subr.mxu0 %v713_v0 }
  0x5f   :  { %519 = vmatprep.mubr.msk.f32.mxu0 %vm714_vm0, %v713_v0  ;;  %504 = vmatprep.subr.mxu1 %v713_v0  ;;  %p683_p10 = por %p682_p9, %p681_p8 }
  0x60   :  { %505 = vmatpush3.msra.mxu1 %v245_v6  ;;  %512 = vmatpush3.msra.mxu0 %v369_v38 }
  0x61   :  { %506 = vmatprep.subr.mxu1 %v713_v0  ;;  %513 = vmatprep.subr.mxu0 %v713_v0  ;;  %p684_p11 = pnand %p683_p10, %p677_p7 }
  0x62   :  { %507 = vmatpush3.msra.mxu1 %v244_v7  ;;  %514 = vmatpush3.msra.mxu0 %v368_v39 }
  0x63   :  { %515 = vmatprep.subr.mxu0 %v713_v0 }
  0x64   :  { %516 = vmatpush3.msra.mxu0 %v367_v40 }
  0x65   :  { %517 = vmatprep.subr.mxu0 %v713_v0 }
  0x66   :  { %518 = vmatpush3.msra.mxu0 %v366_v41 }
 0x11e   :  { %v200_v9 = vpop.f32.mrf.mxu0 }
 0x11f   :  { %v201_v10 = vadd.f32 %v470_v8, %v200_v9  ;;  %v478_v8 = vld [vmem:[%s862_s10] ss:$0 sm:$0xff] }
 0x120   :  { %v499_v11 = vpop.f32.mrf.mxu0 }
 0x121   :  { %v205_v12 = vsel %vm204_vm2, %v201_v10, 0.0 }
 0x122   :  { %v206_v13 = vrot.slane %v205_v12, 4 }
 0x124   :  { %v207_v14 = vadd.f32 %v206_v13, %v205_v12 }
 0x126   :  { %v208_v15 = vrot.slane %v207_v14, 2 }
 0x128   :  { %v209_v16 = vadd.f32 %v208_v15, %v207_v14 }
 0x12a   :  { %v210_v17 = vrot.slane %v209_v16, 1 }
 0x12c   :  { %v211_v18 = vadd.f32 %v210_v17, %v209_v16 }
 0x12e   :  { %v213_v19 = vmul.f32 0.125, %v211_v18 }
 0x130   :  { %v214_v20 = vsub.f32 %v201_v10, %v213_v19 }
 0x132   :  { %v215_v21 = vmul.f32 %v214_v20, %v214_v20 }
 0x134   :  { %v216_v22 = vsel %vm204_vm2, %v215_v21, 0.0 }
 0x135   :  { %v217_v23 = vrot.slane %v216_v22, 4 }
 0x137   :  { %v218_v24 = vadd.f32 %v217_v23, %v216_v22 }
 0x139   :  { %v219_v25 = vrot.slane %v218_v24, 2 }
 0x13b   :  { %v220_v26 = vadd.f32 %v219_v25, %v218_v24 }
 0x13d   :  { %v221_v27 = vrot.slane %v220_v26, 1 }
 0x13f   :  { %v222_v28 = vadd.f32 %v221_v27, %v220_v26 }
 0x141   :  { %v223_v29 = vmul.f32 0.125, %v222_v28 }
 0x143   :  { %v224_v30 = vadd.f32 1e-05, %v223_v29 }
 0x145   :  { %532 = vrsqrt.f32 %v224_v30 }
 0x152   :  { %v533_v31 = vpop.eup %532 }
 0x153   :  { %v226_v33 = vmul.f32 %v533_v31, %v214_v20 }
 0x155   :  { %v234_v35 = vmul.f32 %v472_v32, %v226_v33 }
 0x157   :  { %v242_v36 = vadd.f32 %v473_v34, %v234_v35 }
 0x159   :  { %v243_v37 = vmax.f32 %v242_v36, 0.0 }
 0x15b   :  { %509 = vmatmul.mubr.msk.f32.vlgmr.msra.gmra.mxu1 %vm204_vm2, %v243_v37 }
 0x21b   :  { %v324_v43 = vpop.f32.mrf.mxu1 }
 0x21c   :  { %v325_v44 = vadd.f32 %v474_v42, %v324_v43 }
 0x21d   :  { %v510_v45 = vpop.f32.mrf.mxu1 }
 0x21e   :  { %v328_v46 = vsel %vm204_vm2, %v325_v44, 0.0 }
 0x21f   :  { %v329_v47 = vrot.slane %v328_v46, 4 }
 0x221   :  { %v330_v48 = vadd.f32 %v329_v47, %v328_v46 }
 0x223   :  { %v331_v49 = vrot.slane %v330_v48, 2 }
 0x225   :  { %v332_v50 = vadd.f32 %v331_v49, %v330_v48 }
 0x227   :  { %v333_v51 = vrot.slane %v332_v50, 1 }
 0x229   :  { %v334_v52 = vadd.f32 %v333_v51, %v332_v50 }
 0x22b   :  { %v335_v53 = vmul.f32 0.125, %v334_v52 }
 0x22d   :  { %v336_v54 = vsub.f32 %v325_v44, %v335_v53 }
 0x22f   :  { %v337_v55 = vmul.f32 %v336_v54, %v336_v54 }
 0x231   :  { %v338_v56 = vsel %vm204_vm2, %v337_v55, 0.0 }
 0x232   :  { %v339_v57 = vrot.slane %v338_v56, 4 }
 0x234   :  { %v340_v58 = vadd.f32 %v339_v57, %v338_v56 }
 0x236   :  { %v341_v59 = vrot.slane %v340_v58, 2 }
 0x238   :  { %v342_v60 = vadd.f32 %v341_v59, %v340_v58 }
 0x23a   :  { %v343_v61 = vrot.slane %v342_v60, 1 }
 0x23c   :  { %v344_v62 = vadd.f32 %v343_v61, %v342_v60 }
 0x23e   :  { %v345_v63 = vmul.f32 0.125, %v344_v62 }
 0x240   :  { %v346_v0 = vadd.f32 1e-05, %v345_v63 }
 0x242   :  { %534 = vrsqrt.f32 %v346_v0 }
 0x24f   :  { %v535_v1 = vpop.eup %534 }
 0x250   :  { %v348_v3 = vmul.f32 %v535_v1, %v336_v54 }
 0x252   :  { %v356_v5 = vmul.f32 %v476_v2, %v348_v3 }
 0x254   :  { %v364_v6 = vadd.f32 %v477_v4, %v356_v5 }
 0x256   :  { %v365_v7 = vmax.f32 %v364_v6, 0.0 }
 0x258   :  { %520 = vmatmul.mubr.msk.f32.vlgmr.msra.gmra.mxu0 %vm204_vm2, %v365_v7 }
 0x318   :  { %v446_v9 = vpop.f32.mrf.mxu0 }
 0x319   :  { %v447_v10 = vadd.f32 %v478_v8, %v446_v9 }
 0x31a   :  { %v521_v11 = vpop.f32.mrf.mxu0 }
 0x31b   :  { %451 = vst.msk [vmem:[#allocation14] sm:$0xff] %vm450_vm3, %v447_v10 }
 0x31c   :  { %687 = shalt.err (!%p684_p11)
}
 0x31d   :  { %461 = dma.vmem_to_hbm [thread:$0]  %s459_s29, 128, %s863_s11, [#allocation4]  }
 0x31e   :  { %704 = dma.done.wait [#allocation4], 128  }
 0x31f   :  { %705 = vsyncadd [#allocation4], 4294967168 }
 0x320   :  { %465 = vsyncpa [#allocation3], 1 }
 0x321   :  { %466 = vsyncpa [#allocation6], 1 }
 0x322   :  { %467 = vsyncpa [#allocation9], 1 }
 0x323   :  { %468 = vsyncpa [#allocation12], 1 }
 0x324   :  { %469 = vsyncpa [#allocation4], 1 }

</bundles_post_ra>
